<compile_context>
chip_gen: v5e
topology: v5e:2x2
jax: 0.10.0
libtpu: 0.0.40
codegen_flags: <defaults>
</compile_context>

<pallas_src>
import jax
import jax.numpy as jnp
from jax.experimental import pallas as pl
from jax.experimental.pallas import tpu as pltpu


N_INPUT = 4
SIZE_H = 256
N_OUTPUT = 3
MAX_TILE_B = 1024  # batch-tile (lane axis); multiple of 128


def _round_up(n, m):
    return ((n + m - 1) // m) * m


def mlp_kernel(x_ref, w_in_ref, b_in_ref, w_out_ref, b_out_ref, o_ref):
    # x_ref:     (N_INPUT,  TILE_B)   compute dtype (f32 or bf16)
    # w_in_ref:  (SIZE_H,   N_INPUT)  compute dtype
    # b_in_ref:  (SIZE_H,   1)        f32
    # w_out_ref: (N_OUTPUT, SIZE_H)   compute dtype
    # b_out_ref: (N_OUTPUT, 1)        f32
    # o_ref:     (N_OUTPUT, TILE_B)   f32 (lane-dense store)

    # fc_in:  h^T = W_in @ x^T  -> (SIZE_H, TILE_B), f32 accumulation on MXU.
    h = jnp.dot(w_in_ref[...], x_ref[...], preferred_element_type=jnp.float32)
    h = jnp.maximum(h + b_in_ref[...], 0.0)  # bias broadcast along lanes + ReLU

    # fc_out: out^T = W_out @ h^T -> (N_OUTPUT, TILE_B)
    out = jnp.dot(w_out_ref[...], h.astype(w_out_ref.dtype),
                  preferred_element_type=jnp.float32)
    out = out + b_out_ref[...]
    o_ref[...] = out.astype(o_ref.dtype)


def mlp_forward(x, w_in, b_in, w_out, b_out, *,
                compute_dtype=jnp.float32, max_tile_b=MAX_TILE_B):
    """x: any shape whose elements flatten to (-1, N_INPUT)  (x.view(-1, n_input)).
    w_in: (SIZE_H, N_INPUT), b_in: (SIZE_H,)    (PyTorch Linear convention)
    w_out: (N_OUTPUT, SIZE_H), b_out: (N_OUTPUT,)
    compute_dtype: jnp.float32 (exact parity) or jnp.bfloat16 (faster, mem-bound win).
    Returns (batch, N_OUTPUT) in float32.
    """
    x2 = x.reshape(-1, N_INPUT)          # x.view(-1, n_input)
    batch = x2.shape[0]

    # Put batch on the lane axis: (N_INPUT, batch).
    xt = x2.T

    # Lane-aligned tile: at most max_tile_b, at least one 128-lane block.
    tile_b = min(max_tile_b, _round_up(batch, 128))
    padded = _round_up(batch, tile_b)
    if padded != batch:
        # Small pad of the lane dim only; fuses with the transpose above.
        xt = jnp.pad(xt, ((0, 0), (0, padded - batch)))

    xt = xt.astype(compute_dtype)
    w_in_c = w_in.astype(compute_dtype)        # (SIZE_H, N_INPUT), used as-is
    w_out_c = w_out.astype(compute_dtype)      # (N_OUTPUT, SIZE_H), used as-is
    b_in_col = b_in.reshape(SIZE_H, 1).astype(jnp.float32)
    b_out_col = b_out.reshape(N_OUTPUT, 1).astype(jnp.float32)

    grid = (padded // tile_b,)

    flops = 2 * padded * (N_INPUT * SIZE_H + SIZE_H * N_OUTPUT)
    bytes_accessed = (
        padded * N_INPUT * xt.dtype.itemsize          # read x^T
        + padded * N_OUTPUT * 4                       # write out^T (f32)
        + w_in_c.size * w_in_c.dtype.itemsize
        + w_out_c.size * w_out_c.dtype.itemsize
        + (SIZE_H + N_OUTPUT) * 4                     # biases
    )

    out_t = pl.pallas_call(
        mlp_kernel,
        out_shape=jax.ShapeDtypeStruct((N_OUTPUT, padded), jnp.float32),
        grid_spec=pltpu.PrefetchScalarGridSpec(
            num_scalar_prefetch=0,
            grid=grid,
            in_specs=[
                pl.BlockSpec((N_INPUT, tile_b), lambda i: (0, i)),
                pl.BlockSpec((SIZE_H, N_INPUT), lambda i: (0, 0)),
                pl.BlockSpec((SIZE_H, 1), lambda i: (0, 0)),
                pl.BlockSpec((N_OUTPUT, SIZE_H), lambda i: (0, 0)),
                pl.BlockSpec((N_OUTPUT, 1), lambda i: (0, 0)),
            ],
            out_specs=pl.BlockSpec((N_OUTPUT, tile_b), lambda i: (0, i)),
        ),
        compiler_params=pltpu.CompilerParams(
            dimension_semantics=("parallel",)),
        cost_estimate=pl.CostEstimate(
            flops=flops, transcendentals=0, bytes_accessed=bytes_accessed),
    )(xt, w_in_c, b_in_col, w_out_c, b_out_col)

    # Un-transpose (tiny: batch x 3) and drop padded columns.
    return out_t[:, :batch].T


def init_params(key):
    """Deterministic init matching the module's __init__ shapes.
    Weights ~ U(-0.1, 0.1) (nn.init.uniform_); biases use PyTorch's default
    Linear bias init U(-1/sqrt(fan_in), 1/sqrt(fan_in))."""
    k1, k2, k3, k4 = jax.random.split(key, 4)
    w_in = jax.random.uniform(k1, (SIZE_H, N_INPUT), jnp.float32, -0.1, 0.1)
    b_in = jax.random.uniform(k2, (SIZE_H,), jnp.float32,
                              -1.0 / jnp.sqrt(N_INPUT), 1.0 / jnp.sqrt(N_INPUT))
    w_out = jax.random.uniform(k3, (N_OUTPUT, SIZE_H), jnp.float32, -0.1, 0.1)
    b_out = jax.random.uniform(k4, (N_OUTPUT,), jnp.float32,
                               -1.0 / jnp.sqrt(SIZE_H), 1.0 / jnp.sqrt(SIZE_H))
    return w_in, b_in, w_out, b_out


def _reference(x, w_in, b_in, w_out, b_out):
    x2 = x.reshape(-1, N_INPUT)
    return jnp.maximum(x2 @ w_in.T + b_in, 0.0) @ w_out.T + b_out


if __name__ == "__main__":
    key = jax.random.PRNGKey(0)
    k_x1, k_x2, k_p = jax.random.split(key, 3)

    w_in, b_in, w_out, b_out = init_params(k_p)

    # Case 1: tiny multi-dim input exercising x.view(-1, n_input): (2,4,4) -> (8,4)
    x_small = jax.random.normal(k_x1, (2, 4, 4), dtype=jnp.float32)
    out_small = jax.block_until_ready(
        mlp_forward(x_small, w_in, b_in, w_out, b_out))
    ref_small = _reference(x_small, w_in, b_in, w_out, b_out)
    assert out_small.shape == (8, N_OUTPUT)
    assert jnp.allclose(out_small, ref_small, atol=1e-5, rtol=1e-5)

    # Case 2: larger, non-tile-multiple batch (exercises padding + multi-step grid).
    x_big = jax.random.normal(k_x2, (2500, N_INPUT), dtype=jnp.float32)
    out_big = jax.block_until_ready(
        mlp_forward(x_big, w_in, b_in, w_out, b_out))
    ref_big = _reference(x_big, w_in, b_in, w_out, b_out)
    assert out_big.shape == (2500, N_OUTPUT)
    assert jnp.allclose(out_big, ref_big, atol=1e-5, rtol=1e-5)

    # Case 3: opt-in bf16 compute path (f32 accumulation) — looser tolerance.
    out_bf16 = jax.block_until_ready(
        mlp_forward(x_big, w_in, b_in, w_out, b_out,
                    compute_dtype=jnp.bfloat16))
    assert out_bf16.shape == (2500, N_OUTPUT)
    assert jnp.allclose(out_bf16, ref_big, atol=5e-2, rtol=5e-2)

    print("KERNEL_OK")
</pallas_src>

<mosaic_0001>
module attributes {stable_mosaic.version = 11 : i64} {
  func.func @mlp_kernel(%arg0: i32, %arg1: memref<4x128xf32, #tpu.memory_space<vmem>>, %arg2: memref<256x4xf32, #tpu.memory_space<vmem>>, %arg3: memref<256x1xf32, #tpu.memory_space<vmem>>, %arg4: memref<3x256xf32, #tpu.memory_space<vmem>>, %arg5: memref<3x1xf32, #tpu.memory_space<vmem>>, %arg6: memref<3x128xf32, #tpu.memory_space<vmem>>) attributes {dimension_semantics = [#tpu.dimension_semantics<parallel>], iteration_bounds = array<i64: 1>, scalar_prefetch = 0 : i64, scratch_operands = 0 : i64, tpu.core_type = #tpu.core_type<tc>, window_params = [{transform_indices = @transform_0, window_bounds = array<i64: 4, 128>}, {pipeline_mode = #tpu.pipeline_mode<synchronous>, transform_indices = @transform_1, window_bounds = array<i64: 256, 4>}, {pipeline_mode = #tpu.pipeline_mode<synchronous>, transform_indices = @transform_2, window_bounds = array<i64: 256, 1>}, {pipeline_mode = #tpu.pipeline_mode<synchronous>, transform_indices = @transform_3, window_bounds = array<i64: 3, 256>}, {pipeline_mode = #tpu.pipeline_mode<synchronous>, transform_indices = @transform_4, window_bounds = array<i64: 3, 1>}, {transform_indices = @transform_5, window_bounds = array<i64: 3, 128>}]} {
    %c0 = arith.constant 0 : index
    %c0_0 = arith.constant 0 : index
    %0 = vector.load %arg2[%c0, %c0_0] : memref<256x4xf32, #tpu.memory_space<vmem>>, vector<256x4xf32>
    %c0_1 = arith.constant 0 : index
    %c0_2 = arith.constant 0 : index
    %1 = vector.load %arg1[%c0_1, %c0_2] : memref<4x128xf32, #tpu.memory_space<vmem>>, vector<4x128xf32>
    %cst = arith.constant dense<0.000000e+00> : vector<256x128xf32>
    %2 = tpu.matmul %0, %1, %cst {dimension_numbers = #tpu.dot_dimension_numbers<[1], [0], [0], [1], [0, 0, 1, 1], [], []>} : vector<256x4xf32>, vector<4x128xf32>, vector<256x128xf32> -> vector<256x128xf32>
    %c0_3 = arith.constant 0 : index
    %c0_4 = arith.constant 0 : index
    %3 = vector.load %arg3[%c0_3, %c0_4] : memref<256x1xf32, #tpu.memory_space<vmem>>, vector<256x1xf32>
    %4 = vector.broadcast %3 : vector<256x1xf32> to vector<256x128xf32>
    %5 = arith.addf %2, %4 : vector<256x128xf32>
    %cst_5 = arith.constant 0.000000e+00 : f32
    %6 = vector.broadcast %cst_5 : f32 to vector<256x128xf32>
    %7 = arith.maximumf %5, %6 : vector<256x128xf32>
    %c0_6 = arith.constant 0 : index
    %c0_7 = arith.constant 0 : index
    %8 = vector.load %arg4[%c0_6, %c0_7] : memref<3x256xf32, #tpu.memory_space<vmem>>, vector<3x256xf32>
    %cst_8 = arith.constant dense<0.000000e+00> : vector<3x128xf32>
    %9 = tpu.matmul %8, %7, %cst_8 {dimension_numbers = #tpu.dot_dimension_numbers<[1], [0], [0], [1], [0, 0, 1, 1], [], []>} : vector<3x256xf32>, vector<256x128xf32>, vector<3x128xf32> -> vector<3x128xf32>
    %c0_9 = arith.constant 0 : index
    %c0_10 = arith.constant 0 : index
    %10 = vector.load %arg5[%c0_9, %c0_10] : memref<3x1xf32, #tpu.memory_space<vmem>>, vector<3x1xf32>
    %11 = vector.broadcast %10 : vector<3x1xf32> to vector<3x128xf32>
    %12 = arith.addf %9, %11 : vector<3x128xf32>
    %c0_11 = arith.constant 0 : index
    %c0_12 = arith.constant 0 : index
    %13 = vector.load %arg6[%c0_11, %c0_12] : memref<3x128xf32, #tpu.memory_space<vmem>>, vector<3x128xf32>
    tpu.vector_store %arg6[%c0_11, %c0_12], %12 {strides = array<i32>} : memref<3x128xf32, #tpu.memory_space<vmem>>, vector<3x128xf32>,
    return
  }
  func.func @transform_0(%arg0: i32) -> (i32, i32) {
    %c0_i32 = arith.constant 0 : i32
    %c0_i32_0 = arith.constant 0 : i32
    return %c0_i32, %arg0 : i32, i32
  }
  func.func @transform_1(%arg0: i32) -> (i32, i32) {
    %c0_i32 = arith.constant 0 : i32
    %c0_i32_0 = arith.constant 0 : i32
    %c0_i32_1 = arith.constant 0 : i32
    return %c0_i32, %c0_i32_0 : i32, i32
  }
  func.func @transform_2(%arg0: i32) -> (i32, i32) {
    %c0_i32 = arith.constant 0 : i32
    %c0_i32_0 = arith.constant 0 : i32
    %c0_i32_1 = arith.constant 0 : i32
    return %c0_i32, %c0_i32_0 : i32, i32
  }
  func.func @transform_3(%arg0: i32) -> (i32, i32) {
    %c0_i32 = arith.constant 0 : i32
    %c0_i32_0 = arith.constant 0 : i32
    %c0_i32_1 = arith.constant 0 : i32
    return %c0_i32, %c0_i32_0 : i32, i32
  }
  func.func @transform_4(%arg0: i32) -> (i32, i32) {
    %c0_i32 = arith.constant 0 : i32
    %c0_i32_0 = arith.constant 0 : i32
    %c0_i32_1 = arith.constant 0 : i32
    return %c0_i32, %c0_i32_0 : i32, i32
  }
  func.func @transform_5(%arg0: i32) -> (i32, i32) {
    %c0_i32 = arith.constant 0 : i32
    %c0_i32_0 = arith.constant 0 : i32
    return %c0_i32, %arg0 : i32, i32
  }
}

</mosaic_0001>

<bundles_post_ra>
// kernel: tpu_custom_call.1
= control target key start
LH: loop header
LB: loop body
LE: loop exit
PB: predicated region body
PF: predicated region fallthrough
CT: control target
= control target key end

     0   :  { %vm343_vm0 = vcmask 1043456   ;;  %v629_v2 = vmov 0   ;;  %vm246_vm1 = vcmask 31744   ;;  %s982_s0 = inlined_call_operand.vmem [shape: f32[4,128], index: 0, kind: input, shape index: {}]   ;;  %s983_s1 = inlined_call_operand.vmem [shape: f32[256,4], index: 1, kind: input, shape index: {}]   ;;  %s984_s2 = inlined_call_operand.vmem [shape: f32[256,1], index: 2, kind: input, shape index: {}]   ;;  %s985_s3 = inlined_call_operand.vmem [shape: f32[3,256], index: 3, kind: input, shape index: {}]   ;;  %s986_s4 = inlined_call_operand.vmem [shape: f32[3,1], index: 4, kind: input, shape index: {}]   ;;  %s987_s5 = inlined_call_operand.hbm [shape: f32[3,128], index: 5, kind: output, shape index: {}]  }
   0x1   :  { %v53_v0 = vld [vmem:[%s982_s0] sm:$0xf]  ;;  %v85_v1 = vld [vmem:[%s984_s2 + $0xf8] sm:$0xff]  ;;  %601 = vset.pattern.permute.xlu1 %v629_v2  ;;  %600 = vset.pattern.permute.xlu0 %v629_v2  ;;  %v43_v5 = vld [vmem:[%s983_s1 + $0xb0] sm:$0xff] }
   0x2   :  { %v69_v3 = vld [vmem:[%s984_s2 + $0x78] sm:$0xff]  ;;  %v21_v4 = vld [vmem:[%s983_s1] sm:$0xff]  ;;  %562 = vmatpush.msk.msra.mxu0 %vm343_vm0, %v53_v0  ;;  %597 = vmatpush.msk.msra.mxu3 %vm343_vm0, %v53_v0  ;;  %v68_v6 = vld [vmem:[%s984_s2 + $0x70] sm:$0xff] }
   0x3   :  { %602 = vset.pattern.permute.xlu2 %v629_v2  ;;  %243 = vperm.xlu0 %600, %v85_v1   ;;  %v36_v7 = vld [vmem:[%s983_s1 + $0x78] sm:$0xff]  ;;  %v84_v8 = vld [vmem:[%s984_s2 + $0xf0] sm:$0xff]  ;;  %v83_v10 = vld [vmem:[%s984_s2 + $0xe8] sm:$0xff] }
   0x4   :  { %163 = vperm.xlu1 %601, %v69_v3   ;;  %563 = vmatmul.msk.f32.vlgmr.msra.gmra.mxu0 %vm246_vm1, %v21_v4  ;;  %v32_v9 = vld [vmem:[%s983_s1 + $0x58] sm:$0xff]  ;;  %v22_v11 = vld [vmem:[%s983_s1 + $0x8] sm:$0xff]  ;;  %v82_v13 = vld [vmem:[%s984_s2 + $0xe0] sm:$0xff] }
   0x5   :  { %585 = vmatmul.msk.f32.vlgmr.msra.gmra.mxu3 %vm246_vm1, %v43_v5  ;;  %158 = vperm.xlu2 %602, %v68_v6   ;;  %v44_v12 = vld [vmem:[%s983_s1 + $0xb8] sm:$0xff]  ;;  %v37_v14 = vld [vmem:[%s983_s1 + $0x80] sm:$0xff] }
   0x6   :  { %596 = vmatpush.msk.msra.mxu2 %vm343_vm0, %v53_v0  ;;  %595 = vmatpush.msk.msra.mxu1 %vm343_vm0, %v53_v0 }
   0x7   :  { %578 = vmatmul.msk.f32.vlgmr.msra.gmra.mxu2 %vm246_vm1, %v36_v7  ;;  %574 = vmatmul.msk.f32.vlgmr.msra.gmra.mxu1 %vm246_vm1, %v32_v9 }
   0xb   :  { %238 = vperm.xlu0 %600, %v84_v8  }
   0xc   :  { %233 = vperm.xlu1 %601, %v83_v10   ;;  %564 = vmatmul.msk.f32.gmra.mxu0 %vm246_vm1, %v22_v11 }
   0xd   :  { %586 = vmatmul.msk.f32.gmra.mxu3 %vm246_vm1, %v44_v12  ;;  %228 = vperm.xlu2 %602, %v82_v13  }
   0xe   :  { %10 = vsyncpa [#allocation3], 0  ;;  %v33_v15 = vld [vmem:[%s983_s1 + $0x60] sm:$0xff]  ;;  %v67_v16 = vld [vmem:[%s984_s2 + $0x68] sm:$0xff]  ;;  %s553_s22 = sshll.u32 %s987_s5, 4  ;;  %s554_s22 = int_to_ptr.hbm [resolvable:$true] %s553_s22 }
   0xf   :  { %579 = vmatmul.msk.f32.gmra.mxu2 %vm246_vm1, %v37_v14  ;;  %v81_v17 = vld [vmem:[%s984_s2 + $0xd8] sm:$0xff]  ;;  %v23_v18 = vld [vmem:[%s983_s1 + $0x10] sm:$0xff]  ;;  %575 = vmatmul.msk.f32.gmra.mxu1 %vm246_vm1, %v33_v15  ;;  %v45_v19 = vld [vmem:[%s983_s1 + $0xc0] sm:$0xff] }
  0x10   :  { %v66_v20 = vld [vmem:[%s984_s2 + $0x60] sm:$0xff]  ;;  %v38_v21 = vld [vmem:[%s983_s1 + $0x88] sm:$0xff]  ;;  %v80_v23 = vld [vmem:[%s984_s2 + $0xd0] sm:$0xff] }
  0x11   :  { %v34_v22 = vld [vmem:[%s983_s1 + $0x68] sm:$0xff]  ;;  %v65_v24 = vld [vmem:[%s984_s2 + $0x58] sm:$0xff]  ;;  %v39_v28 = vld [vmem:[%s983_s1 + $0x90] sm:$0xff] }
  0x12   :  { %v24_v25 = vld [vmem:[%s983_s1 + $0x18] sm:$0xff]  ;;  %v46_v26 = vld [vmem:[%s983_s1 + $0xc8] sm:$0xff]  ;;  %v35_v29 = vld [vmem:[%s983_s1 + $0x70] sm:$0xff] }
  0x13   :  { %153 = vperm.xlu0 %600, %v67_v16   ;;  %v79_v27 = vld [vmem:[%s984_s2 + $0xc8] sm:$0xff]  ;;  %v64_v30 = vld [vmem:[%s984_s2 + $0x50] sm:$0xff]  ;;  %v78_v31 = vld [vmem:[%s984_s2 + $0xc0] sm:$0xff] }
  0x14   :  { %223 = vperm.xlu1 %601, %v81_v17   ;;  %565 = vmatmul.msk.f32.gmra.mxu0 %vm246_vm1, %v23_v18  ;;  %v25_v32 = vld [vmem:[%s983_s1 + $0x20] sm:$0xff]  ;;  %v47_v33 = vld [vmem:[%s983_s1 + $0xd0] sm:$0xff]  ;;  %v63_v34 = vld [vmem:[%s984_s2 + $0x48] sm:$0xff] }
  0x15   :  { %587 = vmatmul.msk.f32.gmra.mxu3 %vm246_vm1, %v45_v19  ;;  %148 = vperm.xlu2 %602, %v66_v20   ;;  %v40_v35 = vld [vmem:[%s983_s1 + $0x98] sm:$0xff]  ;;  %v62_v37 = vld [vmem:[%s984_s2 + $0x40] sm:$0xff]  ;;  %v26_v38 = vld [vmem:[%s983_s1 + $0x28] sm:$0xff] }
  0x16   :  { %v77_v36 = vld [vmem:[%s984_s2 + $0xb8] sm:$0xff]  ;;  %v76_v40 = vld [vmem:[%s984_s2 + $0xb0] sm:$0xff]  ;;  %v41_v41 = vld [vmem:[%s983_s1 + $0xa0] sm:$0xff] }
  0x17   :  { %580 = vmatmul.msk.f32.gmra.mxu2 %vm246_vm1, %v38_v21  ;;  %576 = vmatmul.msk.f32.gmra.mxu1 %vm246_vm1, %v34_v22  ;;  %v48_v39 = vld [vmem:[%s983_s1 + $0xd8] sm:$0xff]  ;;  %v75_v43 = vld [vmem:[%s984_s2 + $0xa8] sm:$0xff]  ;;  %v27_v44 = vld [vmem:[%s983_s1 + $0x30] sm:$0xff] }
  0x18   :  { %v61_v42 = vld [vmem:[%s984_s2 + $0x38] sm:$0xff]  ;;  %v49_v45 = vld [vmem:[%s983_s1 + $0xe0] sm:$0xff]  ;;  %v60_v46 = vld [vmem:[%s984_s2 + $0x30] sm:$0xff] }
  0x19   :  { %v42_v47 = vld [vmem:[%s983_s1 + $0xa8] sm:$0xff]  ;;  %v74_v48 = vld [vmem:[%s984_s2 + $0xa0] sm:$0xff]  ;;  %v28_v50 = vld [vmem:[%s983_s1 + $0x38] sm:$0xff] }
  0x1a   :  { %v59_v49 = vld [vmem:[%s984_s2 + $0x28] sm:$0xff]  ;;  %v73_v52 = vld [vmem:[%s984_s2 + $0x98] sm:$0xff]  ;;  %v58_v53 = vld [vmem:[%s984_s2 + $0x20] sm:$0xff] }
  0x1b   :  { %218 = vperm.xlu0 %600, %v80_v23   ;;  %v50_v51 = vld [vmem:[%s983_s1 + $0xe8] sm:$0xff]  ;;  %v72_v54 = vld [vmem:[%s984_s2 + $0x90] sm:$0xff]  ;;  %v29_v55 = vld [vmem:[%s983_s1 + $0x40] sm:$0xff] }
  0x1c   :  { %143 = vperm.xlu1 %601, %v65_v24   ;;  %566 = vmatmul.msk.f32.gmra.mxu0 %vm246_vm1, %v24_v25  ;;  %v51_v56 = vld [vmem:[%s983_s1 + $0xf0] sm:$0xff]  ;;  %v57_v57 = vld [vmem:[%s984_s2 + $0x18] sm:$0xff]  ;;  %v71_v58 = vld [vmem:[%s984_s2 + $0x88] sm:$0xff] }
  0x1d   :  { %588 = vmatmul.msk.f32.gmra.mxu3 %vm246_vm1, %v46_v26  ;;  %213 = vperm.xlu2 %602, %v79_v27   ;;  %v56_v59 = vld [vmem:[%s984_s2 + $0x10] sm:$0xff]  ;;  %v30_v60 = vld [vmem:[%s983_s1 + $0x48] sm:$0xff]  ;;  %v52_v61 = vld [vmem:[%s983_s1 + $0xf8] sm:$0xff] }
  0x1e   :  { %v70_v62 = vld [vmem:[%s984_s2 + $0x80] sm:$0xff]  ;;  %v55_v63 = vld [vmem:[%s984_s2 + $0x8] sm:$0xff]  ;;  %v31_v1 = vld [vmem:[%s983_s1 + $0x50] sm:$0xff] }
  0x1f   :  { %581 = vmatmul.msk.f32.gmra.mxu2 %vm246_vm1, %v39_v28  ;;  %577 = vmatmul.msk.f32.gmra.mxu1 %vm246_vm1, %v35_v29  ;;  %v54_v0 = vld [vmem:[%s984_s2] sm:$0xff] }
  0x20   :  { %v493_v2 = vld [vmem:[%s986_s4] sm:$0x7] }
  0x23   :  { %138 = vperm.xlu0 %600, %v64_v30  }
  0x24   :  { %208 = vperm.xlu1 %601, %v78_v31   ;;  %567 = vmatmul.msk.f32.gmra.mxu0 %vm246_vm1, %v25_v32 }
  0x25   :  { %589 = vmatmul.msk.f32.gmra.mxu3 %vm246_vm1, %v47_v33  ;;  %133 = vperm.xlu2 %602, %v63_v34  }
  0x27   :  { %582 = vmatmul.msk.f32.gmra.mxu2 %vm246_vm1, %v40_v35 }
  0x2b   :  { %203 = vperm.xlu0 %600, %v77_v36  }
  0x2c   :  { %128 = vperm.xlu1 %601, %v62_v37   ;;  %568 = vmatmul.msk.f32.gmra.mxu0 %vm246_vm1, %v26_v38 }
  0x2d   :  { %590 = vmatmul.msk.f32.gmra.mxu3 %vm246_vm1, %v48_v39  ;;  %198 = vperm.xlu2 %602, %v76_v40  }
  0x2f   :  { %583 = vmatmul.msk.f32.gmra.mxu2 %vm246_vm1, %v41_v41 }
  0x33   :  { %123 = vperm.xlu0 %600, %v61_v42  }
  0x34   :  { %193 = vperm.xlu1 %601, %v75_v43   ;;  %569 = vmatmul.msk.f32.gmra.mxu0 %vm246_vm1, %v27_v44 }
  0x35   :  { %591 = vmatmul.msk.f32.gmra.mxu3 %vm246_vm1, %v49_v45  ;;  %118 = vperm.xlu2 %602, %v60_v46  }
  0x37   :  { %584 = vmatmul.msk.f32.gmra.mxu2 %vm246_vm1, %v42_v47 }
  0x3b   :  { %188 = vperm.xlu0 %600, %v74_v48  }
  0x3c   :  { %113 = vperm.xlu1 %601, %v59_v49   ;;  %570 = vmatmul.msk.f32.gmra.mxu0 %vm246_vm1, %v28_v50 }
  0x3d   :  { %592 = vmatmul.msk.f32.gmra.mxu3 %vm246_vm1, %v50_v51  ;;  %183 = vperm.xlu2 %602, %v73_v52  }
  0x43   :  { %108 = vperm.xlu0 %600, %v58_v53  }
  0x44   :  { %178 = vperm.xlu1 %601, %v72_v54   ;;  %571 = vmatmul.msk.f32.gmra.mxu0 %vm246_vm1, %v29_v55 }
  0x45   :  { %593 = vmatmul.msk.f32.gmra.mxu3 %vm246_vm1, %v51_v56  ;;  %103 = vperm.xlu2 %602, %v57_v57  }
  0x4b   :  { %173 = vperm.xlu0 %600, %v71_v58  }
  0x4c   :  { %98 = vperm.xlu1 %601, %v56_v59   ;;  %572 = vmatmul.msk.f32.gmra.mxu0 %vm246_vm1, %v30_v60  ;;  %v492_v60 = vld [vmem:[%s985_s3] sm:$0x77]  ;;  %s630_s3 = smov [#allocation2]  }
  0x4d   :  { %594 = vmatmul.msk.f32.gmra.mxu3 %vm246_vm1, %v52_v61  ;;  %168 = vperm.xlu2 %602, %v70_v62   ;;  %500 = vst [vmem:[#allocation1] ss:$2 sm:$0xff] %v492_v60  ;;  %s551_s4 = sshll.u32 %s630_s3, 4  ;;  %s552_s4 = int_to_ptr.vmem [resolvable:$true] %s551_s4 }
  0x53   :  { %93 = vperm.xlu0 %600, %v55_v63  }
  0x54   :  { %88 = vperm.xlu1 %601, %v54_v0   ;;  %573 = vmatmul.msk.f32.gmra.mxu0 %vm246_vm1, %v31_v1 }
  0x55   :  { %496 = vperm.xlu2 %602, %v493_v2  }
  0x5f   :  { %v159_v11 = vpop.permute.xlu2 %158 }
  0x67   :  { %v913_v20 = vpop.permute.xlu2 %228 }
  0x6f   :  { %v149_v27 = vpop.permute.xlu2 %148 }
  0x75   :  { %v895_v3 = vpop.permute.xlu0 %243 }
  0x76   :  { %v164_v4 = vpop.permute.xlu1 %163 }
  0x77   :  { %v214_v42 = vpop.permute.xlu2 %213 }
  0x7d   :  { %v899_v6 = vpop.permute.xlu0 %238 }
  0x7e   :  { %v901_v8 = vpop.permute.xlu1 %233 }
  0x7f   :  { %v134_v48 = vpop.permute.xlu2 %133 }
  0x81   :  { %v897_v5 = vpop.f32.mrf.mxu0 }
  0x84   :  { %v397_v7 = vpop.f32.mrf.mxu1 }
  0x85   :  { %v154_v16 = vpop.permute.xlu0 %153 }
  0x86   :  { %v909_v18 = vpop.permute.xlu1 %223 }
  0x87   :  { %v935_v54 = vpop.permute.xlu2 %198 }
  0x88   :  { %v903_v9 = vpop.f32.mrf.mxu3 }
  0x89   :  { %v905_v10 = vpop.f32.mrf.mxu0 }
  0x8a   :  { %v409_v12 = vpop.f32.mrf.mxu2 }
  0x8b   :  { %v410_v13 = vadd.f32 %v409_v12, %v164_v4 }
  0x8c   :  { %v400_v15 = vpop.f32.mrf.mxu1 }
  0x8d   :  { %v475_v14 = vmax.f32 %v410_v13, 0.0  ;;  %v917_v23 = vpop.permute.xlu0 %218  ;;  %v401_v29 = vadd.f32 %v400_v15, %v149_v27 }
  0x8e   :  { %v144_v25 = vpop.permute.xlu1 %143 }
  0x8f   :  { %505 = vmatpush.msrb.mxu1 %v475_v14  ;;  %v398_v32 = vadd.f32 %v397_v7, %v144_v25  ;;  %v472_v37 = vmax.f32 %v401_v29, 0.0  ;;  %v119_v62 = vpop.permute.xlu2 %118 }
  0x90   :  { %v907_v17 = vpop.f32.mrf.mxu3 }
  0x91   :  { %v911_v19 = vpop.f32.mrf.mxu0  ;;  %v471_v39 = vmax.f32 %v398_v32, 0.0 }
  0x92   :  { %v929_v44 = vpop.f32.mrf.mxu2 }
  0x94   :  { %v403_v21 = vpop.f32.mrf.mxu1 }
  0x95   :  { %v404_v26 = vadd.f32 %v403_v21, %v154_v16  ;;  %v139_v36 = vpop.permute.xlu0 %138 }
  0x96   :  { %v925_v38 = vpop.permute.xlu1 %208 }
  0x97   :  { %v473_v34 = vmax.f32 %v404_v26, 0.0  ;;  %v950_v15 = vpop.permute.xlu2 %183 }
  0x98   :  { %v915_v22 = vpop.f32.mrf.mxu3 }
  0x99   :  { %v919_v24 = vpop.f32.mrf.mxu0 }
  0x9a   :  { %v931_v50 = vpop.f32.mrf.mxu2 }
  0x9c   :  { %v406_v28 = vpop.f32.mrf.mxu1 }
  0x9d   :  { %v407_v30 = vadd.f32 %v406_v28, %v159_v11  ;;  %v927_v43 = vpop.permute.xlu0 %203 }
  0x9e   :  { %v129_v45 = vpop.permute.xlu1 %128 }
  0x9f   :  { %v474_v35 = vmax.f32 %v407_v30, 0.0 }
  0xa0   :  { %v921_v31 = vpop.f32.mrf.mxu3 }
  0xa1   :  { %v923_v33 = vpop.f32.mrf.mxu0  ;;  %506 = vmatpush.msrb.mxu1 %v474_v35 }
  0xa2   :  { %v939_v58 = vpop.f32.mrf.mxu2 }
  0xa3   :  { %507 = vmatpush.msrb.mxu1 %v473_v34 }
  0xa5   :  { %508 = vmatpush.msrb.mxu1 %v472_v37  ;;  %v124_v49 = vpop.permute.xlu0 %123 }
  0xa6   :  { %v933_v52 = vpop.permute.xlu1 %193 }
  0xa7   :  { %509 = vmatpush.msrb.mxu1 %v471_v39 }
  0xa8   :  { %v442_v40 = vpop.f32.mrf.mxu3 }
  0xa9   :  { %v379_v41 = vpop.f32.mrf.mxu0  ;;  %v443_v37 = vadd.f32 %v442_v40, %v917_v23 }
  0xaa   :  { %v944_v1 = vpop.f32.mrf.mxu2 }
  0xad   :  { %v937_v56 = vpop.permute.xlu0 %188 }
  0xae   :  { %v114_v59 = vpop.permute.xlu1 %113 }
  0xb0   :  { %v445_v46 = vpop.f32.mrf.mxu3 }
  0xb1   :  { %v382_v47 = vpop.f32.mrf.mxu0 }
  0xb2   :  { %v424_v30 = vpop.f32.mrf.mxu2 }
  0xb5   :  { %v109_v0 = vpop.permute.xlu0 %108 }
  0xb6   :  { %v946_v2 = vpop.permute.xlu1 %178 }
  0xb8   :  { %v448_v51 = vpop.f32.mrf.mxu3 }
  0xb9   :  { %v385_v53 = vpop.f32.mrf.mxu0  ;;  %v449_v27 = vadd.f32 %v448_v51, %v913_v20  ;;  %v380_v20 = vadd.f32 %v379_v41, %v114_v59  ;;  %v434_v41 = vadd.f32 %v907_v17, %v927_v43 }
  0xbb   :  { %v488_v39 = vmax.f32 %v449_v27, 0.0  ;;  %v465_v40 = vmax.f32 %v380_v20, 0.0 }
  0xbd   :  { %v954_v28 = vpop.permute.xlu0 %173 }
  0xbe   :  { %v99_v34 = vpop.permute.xlu1 %98 }
  0xc0   :  { %v451_v55 = vpop.f32.mrf.mxu3 }
  0xc1   :  { %v388_v57 = vpop.f32.mrf.mxu0  ;;  %v452_v16 = vadd.f32 %v451_v55, %v901_v8 }
  0xc2   :  { %v389_v25 = vadd.f32 %v388_v57, %v129_v45  ;;  %v427_v57 = vpop.f32.mrf.mxu2 }
  0xc3   :  { %v489_v35 = vmax.f32 %v452_v16, 0.0  ;;  %v428_v17 = vadd.f32 %v427_v57, %v933_v52 }
  0xc4   :  { %v468_v8 = vmax.f32 %v389_v25, 0.0 }
  0xc6   :  { %v89_v59 = vpop.permute.xlu1 %88 }
  0xc8   :  { %v454_v61 = vpop.f32.mrf.mxu3 }
  0xc9   :  { %v391_v63 = vpop.f32.mrf.mxu0  ;;  %v455_v7 = vadd.f32 %v454_v61, %v899_v6  ;;  %v386_v6 = vadd.f32 %v385_v53, %v124_v49  ;;  %v104_v53 = vpop.permute.xlu2 %103  ;;  %v483_v61 = vmax.f32 %v434_v41, 0.0 }
  0xca   :  { %v392_v13 = vadd.f32 %v391_v63, %v134_v48  ;;  %v440_v48 = vadd.f32 %v921_v31, %v214_v42  ;;  %v374_v23 = vadd.f32 %v919_v24, %v104_v53  ;;  %v94_v42 = vpop.permute.xlu0 %93  ;;  %v425_v63 = vadd.f32 %v424_v30, %v937_v56 }
  0xcb   :  { %v490_v29 = vmax.f32 %v455_v7, 0.0  ;;  %v467_v45 = vmax.f32 %v386_v6, 0.0  ;;  %v368_v60 = vadd.f32 %v905_v10, %v94_v42  ;;  %v419_v7 = vadd.f32 %v939_v58, %v946_v2 }
  0xcc   :  { %v469_v32 = vmax.f32 %v392_v13, 0.0  ;;  %v485_v31 = vmax.f32 %v440_v48, 0.0  ;;  %v463_v24 = vmax.f32 %v374_v23, 0.0  ;;  %v480_v52 = vmax.f32 %v425_v63, 0.0 }
  0xcd   :  { %v416_v56 = vadd.f32 %v931_v50, %v954_v28 }
  0xcf   :  { %v477_v13 = vmax.f32 %v416_v56, 0.0 }
  0xd0   :  { %v457_v4 = vpop.f32.mrf.mxu3 }
  0xd1   :  { %v458_v11 = vadd.f32 %v457_v4, %v895_v3  ;;  %v394_v12 = vpop.f32.mrf.mxu0  ;;  %v446_v3 = vadd.f32 %v445_v46, %v909_v18  ;;  %v377_v18 = vadd.f32 %v923_v33, %v109_v0  ;;  %v437_v46 = vadd.f32 %v915_v22, %v925_v38  ;;  %v501_v4 = vld.sshfl [vmem:[#allocation1] sm:$0xff pattern:$0x75316420] }
  0xd2   :  { %v395_v14 = vadd.f32 %v394_v12, %v139_v36  ;;  %v383_v36 = vadd.f32 %v382_v47, %v119_v62  ;;  %v486_v47 = vmax.f32 %v443_v37, 0.0  ;;  %v371_v33 = vadd.f32 %v911_v19, %v99_v34 }
  0xd3   :  { %v491_v21 = vmax.f32 %v458_v11, 0.0  ;;  %v487_v49 = vmax.f32 %v446_v3, 0.0  ;;  %v464_v55 = vmax.f32 %v377_v18, 0.0  ;;  %v431_v22 = vadd.f32 %v903_v9, %v935_v54 }
  0xd4   :  { %v470_v26 = vmax.f32 %v395_v14, 0.0  ;;  %v466_v51 = vmax.f32 %v383_v36, 0.0  ;;  %v484_v38 = vmax.f32 %v437_v46, 0.0  ;;  %v462_v43 = vmax.f32 %v371_v33, 0.0 }
  0xd5   :  { %525 = vmatpush.msrb.mxu2 %v491_v21  ;;  %v365_v62 = vadd.f32 %v897_v5, %v89_v59  ;;  %v482_v19 = vmax.f32 %v431_v22, 0.0  ;;  %v461_v9 = vmax.f32 %v368_v60, 0.0  ;;  %v422_v54 = vadd.f32 %v944_v1, %v950_v15  ;;  %v169_v5 = vpop.permute.xlu2 %168  ;;  %v502_v15 = vld.sshfl [vmem:[#allocation1 + $0x8] sm:$0xff pattern:$0x75316420] }
  0xd6   :  { %510 = vmatpush.msrb.mxu1 %v470_v26  ;;  %v481_v0 = vmax.f32 %v428_v17, 0.0  ;;  %v413_v1 = vadd.f32 %v929_v44, %v169_v5  ;;  %v478_v12 = vmax.f32 %v419_v7, 0.0 }
  0xd7   :  { %526 = vmatpush.msrb.mxu2 %v490_v29  ;;  %v460_v10 = vmax.f32 %v365_v62, 0.0  ;;  %v479_v11 = vmax.f32 %v422_v54, 0.0 }
  0xd8   :  { %511 = vmatpush.msrb.mxu1 %v469_v32  ;;  %v476_v14 = vmax.f32 %v413_v1, 0.0 }
  0xd9   :  { %527 = vmatpush.msrb.mxu2 %v489_v35 }
  0xda   :  { %512 = vmatpush.msrb.mxu1 %v468_v8 }
  0xdb   :  { %528 = vmatpush.msrb.mxu2 %v488_v39 }
  0xdc   :  { %513 = vmatpush.msrb.mxu1 %v467_v45 }
  0xdd   :  { %529 = vmatpush.msrb.mxu2 %v487_v49  ;;  %v497_v2 = vpop.permute.xlu2 %496 }
  0xde   :  { %514 = vmatpush.msrb.mxu1 %v466_v51 }
  0xdf   :  { %530 = vmatpush.msrb.mxu2 %v486_v47 }
  0xe0   :  { %515 = vmatpush.msrb.mxu1 %v465_v40 }
  0xe1   :  { %531 = vmatpush.msrb.mxu2 %v485_v31 }
  0xe2   :  { %516 = vmatpush.msrb.mxu1 %v464_v55 }
  0xe3   :  { %532 = vmatpush.msrb.mxu2 %v484_v38 }
  0xe4   :  { %517 = vmatpush.msrb.mxu1 %v463_v24 }
  0xe5   :  { %533 = vmatpush.msrb.mxu2 %v483_v61 }
  0xe6   :  { %518 = vmatpush.msrb.mxu1 %v462_v43 }
  0xe7   :  { %534 = vmatpush.msrb.mxu2 %v482_v19 }
  0xe8   :  { %519 = vmatpush.msrb.mxu1 %v461_v9 }
  0xe9   :  { %535 = vmatpush.msrb.mxu2 %v481_v0 }
  0xea   :  { %520 = vmatpush.msrb.mxu1 %v460_v10 }
  0xeb   :  { %536 = vmatpush.msrb.mxu2 %v480_v52  ;;  %521 = vmatmul.f32.vlgmr.msrb.gmra.mxu1 %v501_v4 }
  0xed   :  { %537 = vmatpush.msrb.mxu2 %v479_v11 }
  0xef   :  { %538 = vmatpush.msrb.mxu2 %v478_v12 }
  0xf1   :  { %539 = vmatpush.msrb.mxu2 %v477_v13 }
  0xf3   :  { %540 = vmatpush.msrb.mxu2 %v476_v14 }
  0xf4   :  { %541 = vmatmul.f32.vlgmr.msrb.gmra.mxu2 %v502_v15 }
 0x168   :  { %v522_v58 = vpop.f32.mrf.mxu1 }
 0x169   :  { %v523_v50 = vadd.f32 %v522_v58, %v497_v2 }
 0x177   :  { %v542_v16 = vpop.f32.mrf.mxu2 }
 0x178   :  { %v543_v44 = vadd.f32 %v542_v16, %v523_v50 }
 0x17a   :  { %545 = vst [vmem:[#allocation2] sm:$0x7] %v543_v44 }
 0x17b   :  { %556 = dma.vmem_to_hbm [thread:$0]  %s552_s4, 64, %s554_s22, [#allocation3]  }
 0x17c   :  { %627 = dma.done.wait [#allocation3], 64  }
 0x17d   :  { %628 = vsyncadd [#allocation3], 4294967232 }
 0x17e   :  { %561 = vsyncpa [#allocation3], 1 }

</bundles_post_ra>
